<compile_context>
chip_gen: v6e
topology: v6e:2x2x1
jax: 0.10.0
libtpu: 0.0.40
codegen_flags: <defaults>
</compile_context>

<pallas_src>
import functools

import jax
import jax.numpy as jnp
from jax.experimental import pallas as pl
from jax.experimental.pallas import tpu as pltpu

LANES = 128
SUBLANES = 8
MAX_TILE_ROWS = 8192                  # 8192 x 128 x 4B = 4 MiB f32 per tile
VMEM_LIMIT_BYTES = 32 * 1024 * 1024   # safe on v5e/v6e (128 MiB) and v7x (64 MiB)


# ----------------------------- kernels --------------------------------------


def _sum_kernel(x_ref, psum_ref, *, tile_rows, tiles_per_split, valid_rows,
                need_mask):
    """Accumulate sum(x) into a resident (8, 128) f32 block per split."""
    @pl.when(pl.program_id(1) == 0)
    def _():
        psum_ref[...] = jnp.zeros_like(psum_ref)

    tile = x_ref[...].astype(jnp.float32)
    if need_mask:
        # Mask rows past the end of the (unpadded) array.  The *intended*
        # tile index is used here, so fully-overshooting split steps (whose
        # DMA index is clamped in the index_map) contribute exactly zero.
        tile_idx = pl.program_id(0) * tiles_per_split + pl.program_id(1)
        row_start = tile_idx * tile_rows
        row_ids = jax.lax.broadcasted_iota(jnp.int32, tile.shape, 0) + row_start
        tile = jnp.where(row_ids < valid_rows, tile, 0.0)

    # (tile_rows, 128) -> (tile_rows//8, 8, 128): layout-trivial split along
    # sublanes; the leading-axis sum is pure vreg-to-vreg VPU adds.
    psum_ref[...] += tile.reshape(-1, SUBLANES, LANES).sum(axis=0)


def _affine_from_partial_kernel(sc_ref, partial_ref, x_ref, o_ref):
    """out = w * (x - mean(x));  sc = [w, 1/n], partial = per-split sums."""
    w = sc_ref[0]
    inv_n = sc_ref[1]
    mean_x = jnp.sum(partial_ref[...]) * inv_n      # tiny XLU reduce per step
    shift = -w * mean_x
    o_ref[...] = (x_ref[...].astype(jnp.float32) * w + shift).astype(o_ref.dtype)


def _affine_kernel(sc_ref, x_ref, o_ref):
    """out = scale * x + shift;  sc = [scale, shift]."""
    o_ref[...] = (x_ref[...].astype(jnp.float32) * sc_ref[0]
                  + sc_ref[1]).astype(o_ref.dtype)


def _fused_kernel(sc_ref, x_ref, o_ref):
    """Single-pass path for VMEM-resident x;  sc = [w, 1/n]."""
    w = sc_ref[0]
    inv_n = sc_ref[1]
    xf = x_ref[...].astype(jnp.float32)
    mean_x = jnp.sum(xf) * inv_n
    o_ref[...] = (xf * w - w * mean_x).astype(o_ref.dtype)


# ----------------------------- wrapper ---------------------------------------


@functools.partial(
    jax.jit, static_argnames=("max_w", "min_w", "subtract_mean", "use_bias")
)
def similarity_calibrator_forward(
    x, w_param, b_param=None, *, max_w=100.0, min_w=0.01,
    subtract_mean=True, use_bias=False,
):
    orig_shape = x.shape
    n = x.size

    # ---- lane-dense 2D view; pad only if numel isn't a multiple of 128 ----
    rows = -(-n // LANES)
    pad = rows * LANES - n
    x_flat = x.reshape(-1)
    if pad:
        # TODO(synk): full-array copy; only hit when numel % 128 != 0.
        x_flat = jnp.pad(x_flat, (0, pad))         # zeros don't affect sum(x)
    x2 = x_flat.reshape(rows, LANES)

    # ---- scalar prep: get_w() = exp(w).clamp_max(max_w).clamp_min(min_w) ----
    w_val = jnp.clip(
        jnp.exp(jnp.asarray(w_param, jnp.float32).reshape(())), min_w, max_w)

    smem_spec = pl.BlockSpec(memory_space=pltpu.MemorySpace.SMEM)

    def _cparams(sem):
        return pltpu.CompilerParams(
            dimension_semantics=sem, vmem_limit_bytes=VMEM_LIMIT_BYTES)

    if subtract_mean:
        inv_n = jnp.float32(1.0 / n)               # true element count
        sc = jnp.stack([w_val, inv_n]).astype(jnp.float32)

        if rows <= MAX_TILE_ROWS:
            # ---- fused single pass: x read from HBM exactly once ----
            full_spec = pl.BlockSpec((rows, LANES), lambda i: (0, 0))
            out2 = pl.pallas_call(
                _fused_kernel,
                out_shape=jax.ShapeDtypeStruct((rows, LANES), x.dtype),
                grid_spec=pltpu.PrefetchScalarGridSpec(
                    num_scalar_prefetch=0, grid=(1,),
                    in_specs=[smem_spec, full_spec],
                    out_specs=full_spec),
                compiler_params=_cparams(("arbitrary",)),
            )(sc, x2)
        else:
            # ---- pass 1: tiled sum(x) with per-core partial accumulators ----
            tile_rows = MAX_TILE_ROWS              # multiple of 32: dense for
            num_tiles = -(-rows // tile_rows)      # f32 / bf16 / int8 packing
            num_splits = 2 if num_tiles >= 2 else 1
            tiles_per_split = -(-num_tiles // num_splits)
            overshoot = num_splits * tiles_per_split > num_tiles
            need_mask = overshoot or (rows % tile_rows != 0)

            if overshoot:
                def in_map1(p, i):
                    return (jnp.minimum(p * tiles_per_split + i, num_tiles - 1), 0)
            else:
                def in_map1(p, i):
                    return (p * tiles_per_split + i, 0)

            partial = pl.pallas_call(
                functools.partial(
                    _sum_kernel, tile_rows=tile_rows,
                    tiles_per_split=tiles_per_split, valid_rows=rows,
                    need_mask=need_mask),
                out_shape=jax.ShapeDtypeStruct(
                    (num_splits * SUBLANES, LANES), jnp.float32),
                grid_spec=pltpu.PrefetchScalarGridSpec(
                    num_scalar_prefetch=0,
                    grid=(num_splits, tiles_per_split),
                    in_specs=[pl.BlockSpec((tile_rows, LANES), in_map1)],
                    out_specs=pl.BlockSpec((SUBLANES, LANES),
                                           lambda p, i: (p, 0))),
                compiler_params=_cparams(("parallel", "arbitrary")),
            )(x2)

            # ---- pass 2: out = w*(x - mean); scale/shift derived in-kernel ----
            tile_spec = pl.BlockSpec((tile_rows, LANES), lambda i: (i, 0))
            out2 = pl.pallas_call(
                _affine_from_partial_kernel,
                out_shape=jax.ShapeDtypeStruct((rows, LANES), x.dtype),
                grid_spec=pltpu.PrefetchScalarGridSpec(
                    num_scalar_prefetch=0, grid=(num_tiles,),
                    in_specs=[smem_spec,
                              pl.BlockSpec((num_splits * SUBLANES, LANES),
                                           lambda i: (0, 0)),
                              tile_spec],
                    out_specs=tile_spec),
                compiler_params=_cparams(("parallel",)),
            )(sc, partial, x2)
    else:
        # ---- no mean subtraction: single streaming affine pass ----
        shift = (jnp.asarray(b_param, jnp.float32).reshape(())
                 if use_bias else jnp.float32(0.0))
        sc = jnp.stack([w_val, shift]).astype(jnp.float32)
        tile_rows = rows if rows <= MAX_TILE_ROWS else MAX_TILE_ROWS
        num_tiles = -(-rows // tile_rows)
        tile_spec = pl.BlockSpec((tile_rows, LANES), lambda i: (i, 0))
        out2 = pl.pallas_call(
            _affine_kernel,
            out_shape=jax.ShapeDtypeStruct((rows, LANES), x.dtype),
            grid_spec=pltpu.PrefetchScalarGridSpec(
                num_scalar_prefetch=0, grid=(num_tiles,),
                in_specs=[smem_spec, tile_spec],
                out_specs=tile_spec),
            compiler_params=_cparams(("parallel",)),
        )(sc, x2)

    out_flat = out2.reshape(-1)
    if pad:
        out_flat = out_flat[:n]
    return out_flat.reshape(orig_shape)


# ----------------------------- reference & test ------------------------------


def _reference(x, w_param, b_param, *, max_w, min_w, subtract_mean, use_bias):
    w = jnp.clip(jnp.exp(jnp.asarray(w_param, jnp.float32).reshape(())),
                 min_w, max_w)
    sims = w * x
    if use_bias:
        sims = sims + jnp.asarray(b_param, jnp.float32).reshape(())
    if subtract_mean:
        return sims - sims.mean()
    return sims


if __name__ == "__main__":
    # deterministic parameter init matching __init__(cal_init): w=log(cal_init), b=0
    cal_init = 2.5
    w_param = jnp.log(jnp.array([cal_init], dtype=jnp.float32))
    b_param = jnp.zeros((1,), dtype=jnp.float32)

    # 1) small similarity volume [B, C, H, W] -> fused single-pass path
    x1 = jax.random.normal(jax.random.PRNGKey(0), (2, 4, 16, 16), dtype=jnp.float32)
    # 2) numel not a multiple of 128 -> pad fallback (still fused)
    x2 = jax.random.normal(jax.random.PRNGKey(1), (3, 5, 7, 11), dtype=jnp.float32)
    # 3) larger volume -> two-pass path: ragged last tile + odd tile count
    x3 = jax.random.normal(jax.random.PRNGKey(2), (2, 10000, 128), dtype=jnp.float32)

    cases = [
        (x1, dict(subtract_mean=True, use_bias=False)),
        (x2, dict(subtract_mean=True, use_bias=False)),
        (x1, dict(subtract_mean=False, use_bias=True)),
        (x3, dict(subtract_mean=True, use_bias=False)),
    ]
    for xv, kw in cases:
        out = similarity_calibrator_forward(
            xv, w_param, b_param, max_w=100.0, min_w=0.01, **kw)
        out = jax.block_until_ready(out)
        ref = _reference(xv, w_param, b_param, max_w=100.0, min_w=0.01, **kw)
        assert out.shape == xv.shape and out.dtype == xv.dtype
        assert jnp.allclose(out, ref, atol=1e-5, rtol=1e-5), (xv.shape, kw)

    print("KERNEL_OK")
</pallas_src>

<mosaic_0001>
module attributes {stable_mosaic.version = 11 : i64} {
  func.func @_fused_kernel(%arg0: i32, %arg1: memref<2xf32, #tpu.memory_space<smem>>, %arg2: memref<16x128xf32, #tpu.memory_space<vmem>>, %arg3: memref<16x128xf32, #tpu.memory_space<vmem>>) attributes {dimension_semantics = [#tpu.dimension_semantics<arbitrary>], iteration_bounds = array<i64: 1>, scalar_prefetch = 0 : i64, scratch_operands = 0 : i64, tpu.core_type = #tpu.core_type<tc>, window_params = [{transform_indices = @transform_0, window_bounds = array<i64: 2>}, {pipeline_mode = #tpu.pipeline_mode<synchronous>, transform_indices = @transform_1, window_bounds = array<i64: 16, 128>}, {pipeline_mode = #tpu.pipeline_mode<synchronous>, transform_indices = @transform_2, window_bounds = array<i64: 16, 128>}]} {
    %c0 = arith.constant 0 : index
    %0 = memref.load %arg1[%c0] : memref<2xf32, #tpu.memory_space<smem>>
    %c1 = arith.constant 1 : index
    %1 = memref.load %arg1[%c1] : memref<2xf32, #tpu.memory_space<smem>>
    %c0_0 = arith.constant 0 : index
    %c0_1 = arith.constant 0 : index
    %2 = vector.load %arg2[%c0_0, %c0_1] : memref<16x128xf32, #tpu.memory_space<vmem>>, vector<16x128xf32>
    %3 = vector.shape_cast %2 : vector<16x128xf32> to vector<1x16x128xf32>
    %cst = arith.constant dense<0.000000e+00> : vector<1xf32>
    %4 = vector.multi_reduction <add>, %3, %cst [1, 2] : vector<1x16x128xf32> to vector<1xf32>
    %5 = vector.shape_cast %4 : vector<1xf32> to vector<1x1x1xf32>
    %6 = vector.extract %5[0, 0, 0] : f32 from vector<1x1x1xf32>
    %7 = arith.mulf %6, %1 : f32
    %8 = vector.broadcast %0 : f32 to vector<16x128xf32>
    %9 = arith.mulf %2, %8 : vector<16x128xf32>
    %10 = arith.mulf %0, %7 : f32
    %11 = vector.broadcast %10 : f32 to vector<16x128xf32>
    %12 = arith.subf %9, %11 : vector<16x128xf32>
    %c0_2 = arith.constant 0 : index
    %c0_3 = arith.constant 0 : index
    %13 = vector.load %arg3[%c0_2, %c0_3] : memref<16x128xf32, #tpu.memory_space<vmem>>, vector<16x128xf32>
    tpu.vector_store %arg3[%c0_2, %c0_3], %12 {strides = array<i32>} : memref<16x128xf32, #tpu.memory_space<vmem>>, vector<16x128xf32>,
    return
  }
  func.func @transform_0(%arg0: i32) -> i32 {
    %c0_i32 = arith.constant 0 : i32
    %c0_i32_0 = arith.constant 0 : i32
    return %c0_i32 : i32
  }
  func.func @transform_1(%arg0: i32) -> (i32, i32) {
    %c0_i32 = arith.constant 0 : i32
    %c0_i32_0 = arith.constant 0 : i32
    %c0_i32_1 = arith.constant 0 : i32
    return %c0_i32, %c0_i32_0 : i32, i32
  }
  func.func @transform_2(%arg0: i32) -> (i32, i32) {
    %c0_i32 = arith.constant 0 : i32
    %c0_i32_0 = arith.constant 0 : i32
    %c0_i32_1 = arith.constant 0 : i32
    return %c0_i32, %c0_i32_0 : i32, i32
  }
}

</mosaic_0001>

<bundles_post_ra>
// kernel: similarity_calibrator_forward.1
= control target key start
LH: loop header
LB: loop body
LE: loop exit
PB: predicated region body
PF: predicated region fallthrough
CT: control target
= control target key end

     0   :  { %7 = vsyncpa [#allocation3], 0  ;;  %s102_s0 = inlined_call_operand.vmem [shape: f32[2], index: 0, kind: input, shape index: {}]   ;;  %s103_s1 = inlined_call_operand.vmem [shape: f32[16,128], index: 1, kind: input, shape index: {}]   ;;  %s104_s2 = inlined_call_operand.vmem [shape: f32[16,128], index: 2, kind: output, shape index: {}]  }
   0x1   :  { %s14_s11 = sshll.u32 %s102_s0, 4  ;;  %s15_s11 = int_to_ptr.vmem [resolvable:$true] %s14_s11 }
   0x2   :  { %s57_s12 = scalar_lea.vmem %s15_s11, 16  ;;  %p62_p1 = scmp.lt.s32.totalorder %s15_s11, %s15_s11 }
   0x3   :  { %p58_p0 = scmp.ne.s32.totalorder %s15_s11, %s57_s12  ;;  %p63_p2 = scmp.lt.s32.totalorder %s57_s12, %s57_s12 }
   0x5   :  { %p64_p3 = por %p63_p2, %p62_p1 }
   0x7   :  { %p65_p4 = pnand %p64_p3, %p58_p0 }
   0x9   :  { %68 = shalt.err (!%p65_p4)
}
   0xa   :  { %s71_s13 = smov [#allocation2]  }
   0xb   :  { %17 = dma.vmem_to_smem %s15_s11, 16, %s71_s13, [#allocation3]  }
   0xc   :  { %69 = dma.done.wait [#allocation3], 16  }
   0xd   :  { %70 = vsyncadd [#allocation3], 4294967280 }
   0xe   :  { %23 = sfence }
   0xf   :  { %v26_v0 = vld [vmem:[%s103_s1] sm:$0xff]  ;;  %v27_v1 = vld [vmem:[%s103_s1 + $0x8] sm:$0xff]  ;;  %s24_s0 = sld [smem:[#allocation2]] }
  0x10   :  { %v28_v2 = vadd.f32 %v27_v1, %v26_v0  ;;  %s53_s18 = sld [smem:[#allocation2 + $0x1]] }
  0x12   :  { %29 = vadd.xlane.f32.xlu0 %v28_v2 }
  0x15   :  { %v39_v10 = vstv %s24_s0 }
  0x16   :  { %v40_v11 = vmul.f32 %v39_v10, %v26_v0  ;;  %v41_v12 = vmul.f32 %v39_v10, %v27_v1 }
  0x9b   :  { %v30_v3 = vpop.xlane.xlu0 %29 }
  0x9c   :  { %v31_v4 = vrot.slane %v30_v3, 4 }
  0x9e   :  { %v32_v5 = vadd.f32 %v31_v4, %v30_v3 }
  0xa0   :  { %v33_v6 = vrot.slane %v32_v5, 2 }
  0xa2   :  { %v34_v7 = vadd.f32 %v33_v6, %v32_v5 }
  0xa4   :  { %v35_v8 = vrot.slane %v34_v7, 1 }
  0xa6   :  { %v36_v9 = vadd.f32 %v35_v8, %v34_v7 }
  0xa8   :  { %54 = vpush %v36_v9 }
  0xd9   :  { %s55_s19 = spop %54 }
  0xda   :  { %s38_s20 = smul.f32 %s55_s19, %s53_s18 }
  0xdc   :  { %s42_s21 = smul.f32 %s38_s20, %s24_s0 }
  0xde   :  { %v43_v13 = vstv %s42_s21 }
  0xdf   :  { %v44_v14 = vsub.f32 %v40_v11, %v43_v13  ;;  %v45_v15 = vsub.f32 %v41_v12, %v43_v13 }
  0xe1   :  { %46 = vst [vmem:[%s104_s2] sm:$0xff] %v44_v14  ;;  %47 = vst [vmem:[%s104_s2 + $0x8] sm:$0xff] %v45_v15 }
  0xe2   :  { %52 = vsyncpa [#allocation3], 1 }

</bundles_post_ra>
